<compile_context>
chip_gen: v7x
topology: tpu7x:2x2x1
jax: 0.10.0
libtpu: 0.0.40
codegen_flags: <defaults>
</compile_context>

<pallas_src>
from functools import partial
from math import gcd

import numpy as np
import jax
import jax.numpy as jnp
from jax.experimental import pallas as pl
from jax.experimental.pallas import tpu as pltpu


def _trunc_lerp_kernel(x_ref, avg_ref, o_ref, *, threshold):
    # All layers truncated (max_layer >= L): pure lerp, no select.
    x = x_ref[...]
    avg = avg_ref[...]                               # (1, D) or (rows, D)
    t = jnp.asarray(threshold, dtype=x.dtype)
    o_ref[...] = (avg + t * (x - avg)).astype(o_ref.dtype)


def _trunc_masked_kernel(x_ref, avg_ref, mask_ref, o_ref, *, threshold):
    # x_ref   : (rows, D) rows of the flattened (N*L, D) latents
    # avg_ref : (1, D) broadcast row, or (rows, D) pre-tiled per-layer avg
    # mask_ref: (rows, 1) int32, 1 where the row's layer index < max_layer
    x = x_ref[...]
    avg = avg_ref[...]
    t = jnp.asarray(threshold, dtype=x.dtype)
    interp = avg + t * (x - avg)                     # torch.lerp(avg, x, t)
    # Lane-broadcast of the tiny int32 mask happens purely in vregs (no full-block
    # iota and no full-block mask materialized in HBM/VMEM); bitwise pass-through
    # of non-truncated layers is preserved by the select.
    m = jnp.broadcast_to(mask_ref[...], x.shape)
    o_ref[...] = jnp.where(m > 0, interp, x).astype(o_ref.dtype)


def _lcm(a, b):
    return a * b // gcd(a, b)


def truncation_forward(x, avg_latent, *, max_layer=8, threshold=0.7):
    """Truncation.forward. x: (N, L, D). Returns (N, L, D)."""
    assert x.ndim == 3
    N, L, D = x.shape
    dtype = x.dtype
    itemsize = jnp.dtype(dtype).itemsize

    if max_layer <= 0:
        return x                                      # nothing truncated -> identity

    # Normalize avg_latent to (1, D) (broadcast) or (L, D) (per-layer).
    if avg_latent.ndim == 1:
        avg2d = avg_latent.reshape(1, D)
    else:
        assert avg_latent.shape in ((1, D), (L, D))
        avg2d = avg_latent
    avg2d = avg2d.astype(dtype)
    per_layer_avg = (avg2d.shape[0] == L) and (L > 1)

    apply_mask = max_layer < L

    # --- Collapse (N, L) -> flat rows: sublane-dense, no per-image L padding.
    total = N * L
    x2 = x.reshape(total, D)

    # Row block must be a multiple of L (so the layer pattern is block-invariant)
    # and of the sublane quantum (8 for 4-byte, 16 for 2-byte dtypes).
    sub = 8 if itemsize >= 4 else (16 if itemsize == 2 else 32)
    q = _lcm(L, sub)

    budget = 8 * 1024 * 1024            # target bytes per step for (x block + out block)
    per_row = 2 * D * itemsize          # x row + out row
    if total < 2 * q:
        rows_block = total              # tiny problem: one full block
    else:
        k_max = max(1, budget // (q * per_row))
        k_cap = max(1, total // (2 * q))        # keep >= 2 grid steps (v7x megacore)
        rows_block = q * min(k_max, k_cap)
    grid = (pl.cdiv(total, rows_block),)

    # avg presented as a (1, D) broadcast row, or tiled to (rows_block, D) when
    # per-layer (block starts are multiples of L, so one tile serves every block).
    if per_layer_avg:
        avg_in = jnp.tile(avg2d, (rows_block // L, 1))
    else:
        avg_in = avg2d[:1]
    avg_rows = avg_in.shape[0]

    # Scoped-VMEM sizing: double-buffered x & out blocks + avg (+ mask) + slack.
    vmem_need = (2 * 2 * rows_block * D * itemsize          # x, out double-buffered
                 + 2 * avg_rows * D * itemsize              # avg (resident)
                 + 2 * rows_block * 4)                      # tiny mask input
    vmem_limit = int(min(max(vmem_need + (2 << 20), 16 << 20), 32 << 20))
    cparams = pltpu.CompilerParams(
        dimension_semantics=("parallel",),
        vmem_limit_bytes=vmem_limit,
    )

    x_spec = pl.BlockSpec((rows_block, D), lambda b: (b, 0))
    avg_spec = pl.BlockSpec((avg_rows, D), lambda b: (0, 0))
    out_spec = pl.BlockSpec((rows_block, D), lambda b: (b, 0))
    out_shape = jax.ShapeDtypeStruct((total, D), dtype)

    if apply_mask:
        # Per-row truncation mask for one block (identical for every block since
        # rows_block % L == 0): 1 where layer-of-row < max_layer.
        layer_of_row = np.tile(np.arange(L, dtype=np.int32), rows_block // L)
        mask_rows = jnp.asarray(
            (layer_of_row < max_layer).astype(np.int32).reshape(rows_block, 1))
        out2 = pl.pallas_call(
            partial(_trunc_masked_kernel, threshold=threshold),
            out_shape=out_shape,
            grid_spec=pltpu.PrefetchScalarGridSpec(
                num_scalar_prefetch=0,
                grid=grid,
                in_specs=[x_spec, avg_spec,
                          pl.BlockSpec((rows_block, 1), lambda b: (0, 0))],
                out_specs=out_spec),
            compiler_params=cparams,
        )(x2, avg_in, mask_rows)
    else:
        out2 = pl.pallas_call(
            partial(_trunc_lerp_kernel, threshold=threshold),
            out_shape=out_shape,
            grid_spec=pltpu.PrefetchScalarGridSpec(
                num_scalar_prefetch=0,
                grid=grid,
                in_specs=[x_spec, avg_spec],
                out_specs=out_spec),
            compiler_params=cparams,
        )(x2, avg_in)

    return out2.reshape(N, L, D)


def _reference(x, avg_latent, max_layer, threshold):
    # Pure-JAX reference matching torch.lerp + torch.where semantics.
    if avg_latent.ndim == 1:
        avg = avg_latent[None, None, :]
    else:
        avg = avg_latent[None, :, :]
    interp = avg + threshold * (x - avg)
    do_trunc = (jnp.arange(x.shape[1]) < max_layer)[None, :, None]
    return jnp.where(do_trunc, interp, x)


if __name__ == "__main__":
    # Truncation(avg_latent, max_layer=8, threshold=0.7)
    N, L, D = 2, 10, 128               # batch, style layers, latent dim
    max_layer, threshold = 8, 0.7

    key = jax.random.PRNGKey(0)
    kx, ka = jax.random.split(key)
    x = jax.random.normal(kx, (N, L, D), dtype=jnp.float32)
    avg_latent = jax.random.normal(ka, (D,), dtype=jnp.float32)

    # Main path: partial truncation (masked-select kernel).
    out = truncation_forward(x, avg_latent, max_layer=max_layer, threshold=threshold)
    out = jax.block_until_ready(out)
    ref = _reference(x, avg_latent, max_layer, threshold)
    assert out.shape == (N, L, D)
    assert jnp.allclose(out, ref, atol=1e-6, rtol=1e-6)

    # Specialization: truncate every layer (pure-lerp kernel, no mask input).
    out_all = jax.block_until_ready(
        truncation_forward(x, avg_latent, max_layer=L + 2, threshold=threshold))
    assert jnp.allclose(out_all, _reference(x, avg_latent, L + 2, threshold),
                        atol=1e-6, rtol=1e-6)

    # Specialization: truncate no layer (identity, no kernel launched).
    out_none = truncation_forward(x, avg_latent, max_layer=0, threshold=threshold)
    assert jnp.allclose(out_none, x)

    print("KERNEL_OK")
</pallas_src>

<mosaic_0001>
module attributes {stable_mosaic.version = 11 : i64} {
  func.func @_trunc_masked_kernel(%arg0: i32, %arg1: memref<20x128xf32, #tpu.memory_space<vmem>>, %arg2: memref<1x128xf32, #tpu.memory_space<vmem>>, %arg3: memref<20x1xi32, #tpu.memory_space<vmem>>, %arg4: memref<20x128xf32, #tpu.memory_space<vmem>>) attributes {dimension_semantics = [#tpu.dimension_semantics<parallel>], iteration_bounds = array<i64: 1>, scalar_prefetch = 0 : i64, scratch_operands = 0 : i64, tpu.core_type = #tpu.core_type<tc>, window_params = [{transform_indices = @transform_0, window_bounds = array<i64: 20, 128>}, {pipeline_mode = #tpu.pipeline_mode<synchronous>, transform_indices = @transform_1, window_bounds = array<i64: 1, 128>}, {pipeline_mode = #tpu.pipeline_mode<synchronous>, transform_indices = @transform_2, window_bounds = array<i64: 20, 1>}, {transform_indices = @transform_3, window_bounds = array<i64: 20, 128>}]} {
    %c0 = arith.constant 0 : index
    %c0_0 = arith.constant 0 : index
    %0 = vector.load %arg1[%c0, %c0_0] : memref<20x128xf32, #tpu.memory_space<vmem>>, vector<20x128xf32>
    %c0_1 = arith.constant 0 : index
    %c0_2 = arith.constant 0 : index
    %1 = vector.load %arg2[%c0_1, %c0_2] : memref<1x128xf32, #tpu.memory_space<vmem>>, vector<1x128xf32>
    %2 = vector.broadcast %1 : vector<1x128xf32> to vector<20x128xf32>
    %3 = arith.subf %0, %2 : vector<20x128xf32>
    %cst = arith.constant 0.699999988 : f32
    %4 = vector.broadcast %cst : f32 to vector<20x128xf32>
    %5 = arith.mulf %4, %3 : vector<20x128xf32>
    %6 = vector.broadcast %1 : vector<1x128xf32> to vector<20x128xf32>
    %7 = arith.addf %6, %5 : vector<20x128xf32>
    %c0_3 = arith.constant 0 : index
    %c0_4 = arith.constant 0 : index
    %8 = vector.load %arg3[%c0_3, %c0_4] : memref<20x1xi32, #tpu.memory_space<vmem>>, vector<20x1xi32>
    %9 = vector.shape_cast %8 : vector<20x1xi32> to vector<20x1xi32>
    %10 = vector.broadcast %9 : vector<20x1xi32> to vector<20x128xi32>
    %c0_i32 = arith.constant 0 : i32
    %11 = vector.broadcast %c0_i32 : i32 to vector<20x128xi32>
    %12 = arith.cmpi sgt, %10, %11 : vector<20x128xi32>
    %13 = arith.select %12, %7, %0 : vector<20x128xi1>, vector<20x128xf32>
    %c0_5 = arith.constant 0 : index
    %c0_6 = arith.constant 0 : index
    %14 = vector.load %arg4[%c0_5, %c0_6] : memref<20x128xf32, #tpu.memory_space<vmem>>, vector<20x128xf32>
    tpu.vector_store %arg4[%c0_5, %c0_6], %13 {strides = array<i32>} : memref<20x128xf32, #tpu.memory_space<vmem>>, vector<20x128xf32>,
    return
  }
  func.func @transform_0(%arg0: i32) -> (i32, i32) {
    %c0_i32 = arith.constant 0 : i32
    %c0_i32_0 = arith.constant 0 : i32
    return %arg0, %c0_i32 : i32, i32
  }
  func.func @transform_1(%arg0: i32) -> (i32, i32) {
    %c0_i32 = arith.constant 0 : i32
    %c0_i32_0 = arith.constant 0 : i32
    %c0_i32_1 = arith.constant 0 : i32
    return %c0_i32, %c0_i32_0 : i32, i32
  }
  func.func @transform_2(%arg0: i32) -> (i32, i32) {
    %c0_i32 = arith.constant 0 : i32
    %c0_i32_0 = arith.constant 0 : i32
    %c0_i32_1 = arith.constant 0 : i32
    return %c0_i32, %c0_i32_0 : i32, i32
  }
  func.func @transform_3(%arg0: i32) -> (i32, i32) {
    %c0_i32 = arith.constant 0 : i32
    %c0_i32_0 = arith.constant 0 : i32
    return %arg0, %c0_i32 : i32, i32
  }
}

</mosaic_0001>

<bundles_post_ra>
// kernel: tpu_custom_call.1
= control target key start
LH: loop header
LB: loop body
LE: loop exit
PB: predicated region body
PF: predicated region fallthrough
CT: control target
= control target key end

     0   :  { %v102_v2 = vmov 0   ;;  %s159_s0 = inlined_call_operand.vmem [shape: f32[20,128], index: 0, kind: input, shape index: {}]   ;;  %s160_s1 = inlined_call_operand.vmem [shape: f32[1,128], index: 1, kind: input, shape index: {}]   ;;  %s161_s2 = inlined_call_operand.vmem [shape: s32[20,1], index: 2, kind: input, shape index: {}]   ;;  %s162_s3 = inlined_call_operand.hbm [shape: f32[20,128], index: 3, kind: output, shape index: {}]  }
   0x1   :  { %v34_v0 = vld [vmem:[%s161_s2] sm:$0xff]  ;;  %v36_v1 = vld [vmem:[%s161_s2 + $0x10] sm:$0xf]  ;;  %76 = vset.pattern.permute.xlu0 %v102_v2  ;;  %77 = vset.pattern.permute.xlu1 %v102_v2 }
   0x2   :  { %38 = vperm.xlu0 %76, %v34_v0   ;;  %44 = vperm.xlu1 %77, %v36_v1  }
   0x3   :  { %8 = vsyncpa [#allocation3], 0  ;;  %v35_v3 = vld [vmem:[%s161_s2 + $0x8] sm:$0xff]  ;;  %v15_v4 = vld [vmem:[%s159_s0] sm:$0xff] }
   0x4   :  { %v71_v5 = vld [vmem:[%s160_s1] ss:$0 sm:$0xff]  ;;  %v17_v6 = vld [vmem:[%s159_s0 + $0x10] sm:$0xf]  ;;  %v16_v9 = vld [vmem:[%s159_s0 + $0x8] sm:$0xff]  ;;  %s103_s1 = smov [#allocation2]  }
   0x5   :  { %v25_v7 = vsub.f32 %v15_v4, %v71_v5  ;;  %v27_v8 = vsub.f32 %v17_v6, %v71_v5  ;;  %v26_v12 = vsub.f32 %v16_v9, %v71_v5  ;;  %s60_s2 = sshll.u32 %s103_s1, 4  ;;  %s61_s2 = int_to_ptr.vmem [resolvable:$true] %s60_s2 }
   0x6   :  { %41 = vperm.xlu0 %76, %v35_v3   ;;  %s78_s0 = scalar_lea.vmem %s61_s2, 384  ;;  %p83_p1 = scmp.lt.s32.totalorder %s61_s2, %s61_s2 }
   0x7   :  { %v28_v10 = vmul.f32 0.7, %v25_v7  ;;  %v30_v11 = vmul.f32 0.7, %v27_v8  ;;  %v29_v15 = vmul.f32 0.7, %v26_v12  ;;  %p79_p0 = scmp.ne.s32.totalorder %s61_s2, %s78_s0  ;;  %p84_p2 = scmp.lt.s32.totalorder %s78_s0, %s78_s0 }
   0x9   :  { %v31_v13 = vadd.f32 %v71_v5, %v28_v10  ;;  %v33_v14 = vadd.f32 %v71_v5, %v30_v11  ;;  %v32_v20 = vadd.f32 %v71_v5, %v29_v15  ;;  %p85_p3 = por %p84_p2, %p83_p1 }
   0xb   :  { %p86_p4 = pnand %p85_p3, %p79_p0 }
  0x81   :  { %v39_v16 = vpop.permute.xlu0 %38  ;;  %v45_v17 = vpop.permute.xlu1 %44 }
  0x82   :  { %vm46_vm0 = vcmp.gt.s32.totalorder %v39_v16, 0  ;;  %vm48_vm1 = vcmp.gt.s32.totalorder %v45_v17, 0 }
  0x83   :  { %v49_v18 = vsel %vm46_vm0, %v31_v13, %v15_v4  ;;  %v51_v19 = vsel %vm48_vm1, %v33_v14, %v17_v6 }
  0x84   :  { %52 = vst [vmem:[#allocation2] sm:$0xff] %v49_v18  ;;  %54 = vst [vmem:[#allocation2 + $0x10] sm:$0xf] %v51_v19 }
  0x85   :  { %v42_v21 = vpop.permute.xlu0 %41 }
  0x86   :  { %vm47_vm2 = vcmp.gt.s32.totalorder %v42_v21, 0 }
  0x87   :  { %v50_v22 = vsel %vm47_vm2, %v32_v20, %v16_v9 }
  0x88   :  { %53 = vst [vmem:[#allocation2 + $0x8] sm:$0xff] %v50_v22 }
  0x89   :  { %89 = shalt.err (!%p86_p4)
}
  0x8a   :  { %s90_s28 = scalar_lea.hbm %s162_s3, 384 }
  0x8b   :  { %p91_p5 = scmp.ne.s32.totalorder %s162_s3, %s90_s28  ;;  %p94_p6 = scmp.lt.u32.totalorder %s90_s28, %s162_s3 }
  0x8d   :  { %p96_p7 = pnand %p94_p6, %p91_p5 }
  0x8f   :  { %99 = shalt.err (!%p96_p7)
}
  0x90   :  { %s104_s6 = smov 128   ;;  %s105_s7 = smov 8  }
  0x91   :  { %66 = dma.vmem_to_hbm [thread:$0]  %s61_s2, 384, %s162_s3, [#allocation3], %s104_s6, %s104_s6, %s105_s7  }
  0x92   :  { %100 = dma.done.wait [#allocation3], 384  }
  0x93   :  { %101 = vsyncadd [#allocation3], 4294966912 }
  0x94   :  { %70 = vsyncpa [#allocation3], 1 }

</bundles_post_ra>
